<compile_context>
chip_gen: v7x
topology: tpu7x:2x2x1
jax: 0.10.0
libtpu: 0.0.40
codegen_flags: <defaults>
</compile_context>

<pallas_src>
import jax
import jax.numpy as jnp
from jax.experimental import pallas as pl
from jax.experimental.pallas import tpu as pltpu


def _project_kernel(x_ref, w_ref, y_ref):
    # Y[r, s_tile] = X[s_tile] @ W[r]   (bf16 inputs, f32 MXU accumulate, bf16 out)
    y_ref[...] = jnp.dot(
        x_ref[...], w_ref[...], preferred_element_type=jnp.float32
    ).astype(y_ref.dtype)


def _aggregate_kernel(a_ref, y_ref, invdeg_ref, xdst_ref, wloop_ref, bias_ref, out_ref):
    """grid = (dst tile i, relation r, src tile k); r and k are reduction axes."""
    r = pl.program_id(1)
    k = pl.program_id(2)

    @pl.when((r == 0) & (k == 0))
    def _init():
        # self-loop + bias, computed once per destination tile; accumulate on top.
        out_ref[...] = (
            jnp.dot(xdst_ref[...], wloop_ref[...], preferred_element_type=jnp.float32)
            + bias_ref[...]
        )

    # Unnormalized message aggregation for this (relation, src-tile) block;
    # right-normalization (1 / in-degree) applied after aggregation, in f32,
    # so the adjacency stays exact 0/1 bf16. The (tm, f_out) VPU scale hides
    # under the (tm, tk, f_out) MXU work.
    agg = jnp.dot(a_ref[...], y_ref[...], preferred_element_type=jnp.float32)
    out_ref[...] += agg * invdeg_ref[...]


def _pad_axis(x, axis, multiple):
    pad = (-x.shape[axis]) % multiple
    if pad == 0:
        return x
    widths = [(0, 0)] * x.ndim
    widths[axis] = (0, pad)
    return jnp.pad(x, widths)


def rel_graph_conv_layer(adj, x, weight, loop_weight, h_bias, *, tm=128, tk=128):
    """adj: [R, N_dst, N_src] 0/1; x: [N_src, F_in] (src feats; dst feats = x[:N_dst]);
    weight: [R, F_in, F_out]; loop_weight: [F_in, F_out]; h_bias: [F_out].
    Returns [N_dst, F_out] float32.

    tm / tk: destination / source node tile sizes. 128 suits the small demo; for real
    graphs use 512-1024 (bf16) and keep 2*(A tile + Y tile) + out tile within the VMEM
    budget (halve tiles on v7x's 64 MiB VMEM).
    """
    assert tm % 8 == 0 and tk % 128 == 0, "tm must be a multiple of 8, tk of 128"
    R, N_dst, N_src = adj.shape
    F_in = x.shape[1]
    F_out = weight.shape[2]

    # In-degree (clamped to 1) -> inverse. Tiny [R, N_dst] reduction over the raw
    # adjacency; the normalized a_norm = adj / deg is NOT materialized in HBM.
    deg = jnp.maximum(jnp.sum(adj, axis=2, dtype=jnp.float32), 1.0)
    inv_deg = (1.0 / deg)[:, :, None]                                   # [R, N_dst, 1] f32

    # bf16 MXU operands; binary adjacency is exact in bf16. Pad node dims to tile
    # multiples and feature dims to lane-dense multiples of 128 (padding is zeros,
    # so padded rows/cols contribute nothing and are sliced off at the end).
    a_b = _pad_axis(_pad_axis(adj.astype(jnp.bfloat16), 1, tm), 2, tk)
    x_b = _pad_axis(_pad_axis(x.astype(jnp.bfloat16), 0, tk), 1, 128)
    xd_b = _pad_axis(_pad_axis(x[:N_dst].astype(jnp.bfloat16), 0, tm), 1, 128)
    w_b = _pad_axis(_pad_axis(weight.astype(jnp.bfloat16), 1, 128), 2, 128)
    wl_b = _pad_axis(_pad_axis(loop_weight.astype(jnp.bfloat16), 0, 128), 1, 128)
    bias_p = _pad_axis(h_bias.reshape(1, F_out).astype(jnp.float32), 1, 128)
    inv_deg = _pad_axis(inv_deg, 1, tm)                                 # padded rows -> 0

    n_dst_p, n_src_p = a_b.shape[1], a_b.shape[2]
    f_in_p, f_out_p = w_b.shape[1], w_b.shape[2]
    n_i, n_k = n_dst_p // tm, n_src_p // tk

    # ---- Kernel 1: hoisted per-relation projection Y[r] = X @ W[r] ----
    y = pl.pallas_call(
        _project_kernel,
        out_shape=jax.ShapeDtypeStruct((R, n_src_p, f_out_p), jnp.bfloat16),
        grid_spec=pltpu.PrefetchScalarGridSpec(
            num_scalar_prefetch=0,
            grid=(R, n_k),
            in_specs=[
                pl.BlockSpec((tk, f_in_p), lambda r, s: (s, 0)),                        # X src tile
                pl.BlockSpec((pl.Squeezed(), f_in_p, f_out_p), lambda r, s: (r, 0, 0)), # W[r]
            ],
            out_specs=pl.BlockSpec((pl.Squeezed(), tk, f_out_p), lambda r, s: (r, s, 0)),
        ),
        compiler_params=pltpu.CompilerParams(
            dimension_semantics=("parallel", "parallel")),
    )(x_b, w_b)

    # ---- Kernel 2: tiled normalized aggregation + self-loop + bias ----
    out_p = pl.pallas_call(
        _aggregate_kernel,
        out_shape=jax.ShapeDtypeStruct((n_dst_p, f_out_p), jnp.float32),
        grid_spec=pltpu.PrefetchScalarGridSpec(
            num_scalar_prefetch=0,
            grid=(n_i, R, n_k),
            in_specs=[
                pl.BlockSpec((pl.Squeezed(), tm, tk), lambda i, r, k: (r, i, k)),       # A[r] tile
                pl.BlockSpec((pl.Squeezed(), tk, f_out_p), lambda i, r, k: (r, k, 0)),  # Y[r] tile
                pl.BlockSpec((pl.Squeezed(), tm, 1), lambda i, r, k: (r, i, 0)),        # 1/in_deg
                pl.BlockSpec((tm, f_in_p), lambda i, r, k: (i, 0)),                     # X_dst tile
                pl.BlockSpec((f_in_p, f_out_p), lambda i, r, k: (0, 0)),                # W_loop
                pl.BlockSpec((1, f_out_p), lambda i, r, k: (0, 0)),                     # bias
            ],
            out_specs=pl.BlockSpec((tm, f_out_p), lambda i, r, k: (i, 0)),
        ),
        compiler_params=pltpu.CompilerParams(
            dimension_semantics=("parallel", "arbitrary", "arbitrary"),
            vmem_limit_bytes=32 * 1024 * 1024),
    )(a_b, y, inv_deg, xd_b, wl_b, bias_p)

    return out_p[:N_dst, :F_out]


def reference(adj, x, weight, loop_weight, h_bias):
    deg = jnp.maximum(adj.sum(axis=2), 1.0)
    a_norm = adj / deg[:, :, None]
    hs = jnp.einsum('rds,sf,rfo->do', a_norm, x, weight)
    return hs + x[: adj.shape[1]] @ loop_weight + h_bias


if __name__ == "__main__":
    key = jax.random.PRNGKey(0)
    k_adj, k_x, k_w, k_loop = jax.random.split(key, 4)

    # Small synthetic heterograph: 1 node type, R=3 relation types. Ragged sizes
    # exercise the pad-to-tile path (padded to 256 nodes / 128 feature lanes).
    R, N, F_in, F_out = 3, 200, 96, 80

    adj = jax.random.bernoulli(k_adj, p=0.3, shape=(R, N, N)).astype(jnp.float32)
    x = jax.random.normal(k_x, (N, F_in), dtype=jnp.float32)

    # Deterministic xavier-uniform style init (gain = sqrt(2), nn.init relu gain).
    gain = 2.0 ** 0.5
    bound_w = gain * (6.0 / (F_in + F_out)) ** 0.5
    weight = jax.random.uniform(k_w, (R, F_in, F_out), jnp.float32,
                                minval=-bound_w, maxval=bound_w)
    loop_weight = jax.random.uniform(k_loop, (F_in, F_out), jnp.float32,
                                     minval=-bound_w, maxval=bound_w)
    h_bias = jnp.zeros((F_out,), jnp.float32)   # nn.init.zeros_

    out = rel_graph_conv_layer(adj, x, weight, loop_weight, h_bias)
    out = jax.block_until_ready(out)

    ref = reference(adj, x, weight, loop_weight, h_bias)
    assert out.shape == (N, F_out)

    # bf16 matmul operands -> allow a few percent relative error vs the f32 reference.
    err = float(jnp.max(jnp.abs(out - ref)))
    scale = float(jnp.max(jnp.abs(ref)))
    assert err <= 0.1 + 0.02 * scale, f"mismatch vs reference: max_abs_err={err}, scale={scale}"

    print("KERNEL_OK")
</pallas_src>

<mosaic_0001>
module attributes {stable_mosaic.version = 11 : i64} {
  func.func @_project_kernel(%arg0: i32, %arg1: i32, %arg2: memref<128x128xbf16, #tpu.memory_space<vmem>>, %arg3: memref<1x128x128xbf16, #tpu.memory_space<vmem>>, %arg4: memref<1x128x128xbf16, #tpu.memory_space<vmem>>) attributes {dimension_semantics = [#tpu.dimension_semantics<parallel>, #tpu.dimension_semantics<parallel>], iteration_bounds = array<i64: 3, 2>, scalar_prefetch = 0 : i64, scratch_operands = 0 : i64, tpu.core_type = #tpu.core_type<tc>, window_params = [{transform_indices = @transform_0, window_bounds = array<i64: 128, 128>}, {transform_indices = @transform_1, window_bounds = array<i64: 1, 128, 128>}, {transform_indices = @transform_2, window_bounds = array<i64: 1, 128, 128>}]} {
    %c0 = arith.constant 0 : index
    %c0_0 = arith.constant 0 : index
    %0 = vector.load %arg2[%c0, %c0_0] : memref<128x128xbf16, #tpu.memory_space<vmem>>, vector<128x128xbf16>
    %c0_1 = arith.constant 0 : index
    %c0_2 = arith.constant 0 : index
    %c0_3 = arith.constant 0 : index
    %1 = vector.load %arg3[%c0_1, %c0_2, %c0_3] : memref<1x128x128xbf16, #tpu.memory_space<vmem>>, vector<1x128x128xbf16>
    %2 = vector.shape_cast %1 : vector<1x128x128xbf16> to vector<128x128xbf16>
    %cst = arith.constant dense<0.000000e+00> : vector<128x128xf32>
    %3 = tpu.matmul %0, %2, %cst {dimension_numbers = #tpu.dot_dimension_numbers<[1], [0], [0], [1], [0, 0, 1, 1], [], []>} : vector<128x128xbf16>, vector<128x128xbf16>, vector<128x128xf32> -> vector<128x128xf32>
    %4 = arith.truncf %3 : vector<128x128xf32> to vector<128x128xbf16>
    %c0_4 = arith.constant 0 : index
    %c0_5 = arith.constant 0 : index
    %c0_6 = arith.constant 0 : index
    %5 = vector.load %arg4[%c0_4, %c0_5, %c0_6] : memref<1x128x128xbf16, #tpu.memory_space<vmem>>, vector<1x128x128xbf16>
    %6 = vector.shape_cast %5 : vector<1x128x128xbf16> to vector<128x128xbf16>
    %7 = vector.shape_cast %4 : vector<128x128xbf16> to vector<1x128x128xbf16>
    tpu.vector_store %arg4[%c0_4, %c0_5, %c0_6], %7 {strides = array<i32>} : memref<1x128x128xbf16, #tpu.memory_space<vmem>>, vector<1x128x128xbf16>,
    return
  }
  func.func @transform_0(%arg0: i32, %arg1: i32) -> (i32, i32) {
    %c0_i32 = arith.constant 0 : i32
    %c0_i32_0 = arith.constant 0 : i32
    return %arg1, %c0_i32 : i32, i32
  }
  func.func @transform_1(%arg0: i32, %arg1: i32) -> (i32, i32, i32) {
    %c0_i32 = arith.constant 0 : i32
    %c0_i32_0 = arith.constant 0 : i32
    %c0_i32_1 = arith.constant 0 : i32
    return %arg0, %c0_i32, %c0_i32_0 : i32, i32, i32
  }
  func.func @transform_2(%arg0: i32, %arg1: i32) -> (i32, i32, i32) {
    %c0_i32 = arith.constant 0 : i32
    %c0_i32_0 = arith.constant 0 : i32
    return %arg0, %arg1, %c0_i32 : i32, i32, i32
  }
}

</mosaic_0001>

<bundles_post_ra>
// kernel: tpu_custom_call.1
= control target key start
LH: loop header
LB: loop body
LE: loop exit
PB: predicated region body
PF: predicated region fallthrough
CT: control target
= control target key end

     0   :  { %s1597_s0 = inlined_call_operand.hbm [shape: bf16[256,128], index: 0, kind: input, shape index: {}]   ;;  %s1598_s1 = inlined_call_operand.hbm [shape: bf16[3,128,128], index: 1, kind: input, shape index: {}]   ;;  %s1599_s2 = inlined_call_operand.hbm [shape: bf16[3,256,128], index: 2, kind: output, shape index: {}]  }
   0x1   :  { %1613 = sst [smem:[#allocation15_spill]] %s1597_s0 }
   0x2   :  { %7 = vsyncpa [#allocation3], 0 }
   0x3   :  { %9 = vsyncpa [#allocation3 + $0x1], 0 }
   0x4   :  { %10 = vsyncpa [#allocation6], 0 }
   0x5   :  { %12 = vsyncpa [#allocation6 + $0x1], 0 }
   0x6   :  { %13 = vsyncpa [#allocation4], 0 }
   0x7   :  { %15 = vsyncpa [#allocation4 + $0x1], 0  ;;  %s1216_s9 = smov 0   ;;  %s1218_s10 = smov 0  }
   0x8   :  { %s1220_s11 = smov 0   ;;  %s1222_s12 = smov 0  }
   0x9   :  { %s1224_s13 = smov 0   ;;  %s1226_s14 = smov 0  }
   0xa   :  { %s1228_s15 = smov 0   ;;  %s1230_s16 = smov 0  }
   0xb   :  { %s1232_s17 = smov 0   ;;  %s1234_s18 = smov 0  }
   0xc   :  { %s1236_s19 = smov 0   ;;  %s1238_s20 = smov 0  }
   0xd   :  { %s1240_s21 = smov 0   ;;  %s1242_s22 = smov 0  }
   0xe LB: > { %1614 = sst [smem:[#allocation11_spill]] %s1184_s20  ;;  %s30_s23 = sadd.s32 1, %s1184_s20  ;;  %s1192_s22 = sphi %s1242_s22, %s21_s22   ;;  %s1188_s21 = sphi %s1240_s21, %s1655_s21   ;;  %s1184_s20 = sphi %s1238_s20, %s1643_s20   ;;  %s1180_s19 = sphi %s1236_s19, %s1642_s19   ;;  %s1176_s18 = sphi %s1234_s18, %s1641_s18   ;;  %s1172_s17 = sphi %s1232_s17, %s1654_s17   ;;  %s1168_s16 = sphi %s1230_s16, %s1653_s16   ;;  %s1164_s15 = sphi %s1228_s15, %s1652_s15   ;;  %s1160_s14 = sphi %s1226_s14, %s1651_s14   ;;  %s1156_s13 = sphi %s1224_s13, %s1650_s13   ;;  %s1152_s12 = sphi %s1222_s12, %s1649_s12   ;;  %s1148_s11 = sphi %s1220_s11, %s1648_s11   ;;  %s1144_s10 = sphi %s1218_s10, %s1647_s10   ;;  %s1140_s9 = sphi %s1216_s9, %s1646_s9  }
   0xf   : > { %1615 = sst [smem:[#allocation12_spill]] %s1188_s21  ;;  %s1600_s24 = sadd.s32 4294967295, %s1192_s22  }
  0x10   : > { %p1286_p0 = scmp.ge.s32.totalorder %s30_s23, 2  ;;  %p47_p1 = scmp.ne.s32.totalorder %s1172_s17, %s1168_s16 }
  0x11   : > { %p1604_p2 = scmp.eq.s32.totalorder %s1192_s22, 0  ;;  %s40_s26 = sadd.s32 1, %s1172_s17 }
  0x12   : > { %s1657_s23 = smov (%p1286_p0, %s30_s23), 0  ;;  %p53_p3 = scmp.ne.s32.totalorder %s1168_s16, %s1164_s15 }
  0x13   : > { %1617 = sst [smem:[#allocation13_spill]] %s1657_s23  ;;  %s1301_s27 = ssub.s32 %s1184_s20, %s1657_s23 }
  0x14   : > { %p1305_p4 = scmp.eq.s32.totalorder %s1600_s24, 0  ;;  %p38_p5 = scmp.eq.s32.totalorder %s1301_s27, 0 }
  0x15   : > { %p49_p6 = por %p1604_p2, %p47_p1  ;;  %p1603_p8 = scmp.lt.s32.totalorder %s1192_s22, 6 }
  0x16   : > { %s1618_s28 = scalar_select %p1305_p4, 1, 0 }
  0x17   : > { %p1314_p7 = por %p1305_p4, %p53_p3  ;;  %s131_s3 = sand.u32 1, %s1172_s17  }
  0x18   : > { %s1319_s30 = scalar_select %p38_p5, %s1172_s17, %s40_s26  }
  0x19   : > { %s1619_s29 = scalar_select %p1314_p7, 1, 0 }
  0x1a   : > { %s654_s4 = sshll.u32 %s131_s3, 6  ;;  %s702_s5 = sshll.u32 %s1184_s20, 10 }
  0x1b   : > { %s1620_s0 = sld [smem:[#allocation15_spill]]  ;;  %s135_s15 = scalar_lea.vmem [#allocation2], %s654_s4 }
  0x1c   : > { %s142_s24 = sshll.u32 %s135_s15, 4  ;;  %p1333_p9 = pnand %p1603_p8, %p49_p6  ;;  %s1329_s24 = int_to_ptr.vmem [resolvable:$true] %s142_s24 }
  0x1d   : > { %s1338_s23 = scalar_lea.sflag [#allocation3], %s131_s3 }
  0x1e   : > { %p984_p12 = pneg %p1333_p9 }
  0x21   : > { %s1327_s8 = scalar_lea.hbm %s1620_s0, %s702_s5  ;;  %s987_s7 = scalar_lea.hbm %s1620_s0, 2048 }
  0x22   : > { %s982_s5 = scalar_lea.hbm %s1327_s8, 1024  ;;  %p988_p3 = scmp.lt.u32.totalorder %s1327_s8, %s1620_s0 }
  0x23   : > { %p983_p11 = scmp.ne.s32.totalorder %s1327_s8, %s982_s5  ;;  %p989_p5 = scmp.lt.u32.totalorder %s987_s7, %s982_s5 }
  0x24   : > { %p991_p8 = scmp.lt.u32.totalorder %s982_s5, %s1327_s8 }
  0x25   : > { %p985_p13 = pnand %p984_p12, %p983_p11  ;;  %p990_p6 = por %p989_p5, %p988_p3 }
  0x27   : > { %p986_p1 = pneg %p985_p13  ;;  %p992_p2 = por %p991_p8, %p990_p6 }
  0x29   : > { %p993_p10 = pnand %p992_p2, %p986_p1 }
  0x2b   : > { %996 = shalt.err (!%p993_p10)
}
  0x2c   : > { %s997_s3 = scalar_lea.vmem %s1329_s24, 1024  ;;  %s1194_s4 = smov [#allocation2]  }
  0x2d   : > { %p998_p11 = scmp.ne.s32.totalorder %s1329_s24, %s997_s3  ;;  %s1002_s6 = sshll.u32 %s1194_s4, 4  ;;  %s1003_s6 = int_to_ptr.vmem [resolvable:$false] %s1002_s6 }
  0x2e   : > { %s1004_s20 = scalar_lea.vmem %s1003_s6, 2048  ;;  %p1005_p4 = scmp.lt.s32.totalorder %s1329_s24, %s1003_s6 }
  0x2f   : > { %p1000_p13 = pnand %p998_p11, %p984_p12  ;;  %p1006_p3 = scmp.lt.s32.totalorder %s1004_s20, %s997_s3 }
  0x31   : > { %p1001_p7 = pneg %p1000_p13  ;;  %p1007_p5 = por %p1006_p3, %p1005_p4 }
  0x33   : > { %p1008_p8 = pnand %p1007_p5, %p1001_p7 }
  0x35   : > { %1011 = shalt.err (!%p1008_p8)
}
  0x36   : > { %s1607_s5 = smov 64   ;;  %s1608_s7 = smov 4  }
  0x37   : > { %840 = dma.hbm_to_vmem [thread:$0]  (!%p1333_p9), %s1327_s8, 1024, %s1329_s24, %s1338_s23, %s1607_s5, %s1607_s5, %s1608_s7  }
  0x38   : > { %s1622_s15 = sadd.s32 4294967295, %s1192_s22   ;;  %p171_p4 = scmp.lt.s32.totalorder %s1192_s22, 7 }
  0x39   : > { %p1371_p2 = scmp.eq.s32.totalorder %s1622_s15, 5  ;;  %p1624_p7 = scmp.ge.s32.totalorder %s1192_s22, 1 }
  0x3a   : > { %s33_s26 = sadd.s32 1, %s1188_s21  ;;  %s651_s23 = sadd.s32 4294967294, %s1192_s22  }
  0x3b   : > { %p1378_p10 = pnand %p1624_p7, %p171_p4  ;;  %s1659_s26 = smov (!%p1286_p0, %s33_s26), %s1188_s21 }
  0x3c   : > { %s66_s24 = sadd.s32 1, %s1160_s14  ;;  %p35_p9 = scmp.ge.s32.totalorder %s1659_s26, 3 }
  0x3d   : > { %p79_p12 = scmp.ne.s32.totalorder %s1156_s13, %s1152_s12  ;;  %p73_p1 = scmp.ne.s32.totalorder %s1160_s14, %s1156_s13 }
  0x3e   : > { %s94_s8 = sadd.s32 1, %s1148_s11  ;;  %s1661_s26 = smov (%p35_p9, %s1659_s26), 0 }
  0x3f   : > { %1626 = sst [smem:[#allocation14_spill]] %s1661_s26  ;;  %p1627_p6 = scmp.ne.s32.totalorder %s1618_s28, 0 }
  0x40   : > { %p104_p0 = scmp.ne.s32.totalorder %s1148_s11, %s1144_s10  ;;  %s63_s6 = ssub.s32 %s1188_s21, %s1661_s26 }
  0x41   : > { %p1397_p11 = por %p79_p12, %p1627_p6  ;;  %p110_p13 = scmp.ne.s32.totalorder %s1144_s10, %s1140_s9 }
  0x42   : > { %p64_p3 = scmp.eq.s32.totalorder %s63_s6, 0  ;;  %s91_s12 = sor.u32 %s63_s6, %s1301_s27 }
  0x43   : > { %s1628_s25 = scalar_select %p1397_p11, 1, 0 }
  0x44   : > { %p92_p5 = scmp.eq.s32.totalorder %s91_s12, 0  ;;  %p1410_p8 = por %p1371_p2, %p104_p0 }
  0x45   : > { %s1415_s15 = scalar_select %p64_p3, %s1160_s14, %s66_s24  }
  0x46   : > { %s1629_s20 = scalar_select %p1410_p8, 1, 0 }
  0x47   : > { %s1418_s28 = scalar_select %p92_p5, %s1148_s11, %s94_s8  }
  0x48   : > { %p111_p4 = scmp.eq.s32.totalorder %s651_s23, 5  ;;  %s152_s5 = sand.u32 1, %s1160_s14  }
  0x49   : > { %p1630_p7 = scmp.eq.s32.totalorder %s1192_s22, 0  ;;  %s657_s7 = sshll.u32 %s152_s5, 6 }
  0x4a   : > { %p1426_p12 = por %p111_p4, %p110_p13  ;;  %s703_s27 = sshll.u32 %s1188_s21, 10 }
  0x4b   : > { %p75_p9 = por %p73_p1, %p1630_p7  ;;  %s156_s3 = scalar_lea.vmem [#allocation5], %s657_s7 }
  0x4c   : > { %s1631_s0 = scalar_select %p1426_p12, 1, 0 }
  0x4d   : > { %s163_s6 = sshll.u32 %s156_s3, 4  ;;  %s1434_s24 = scalar_lea.hbm %s1598_s1, %s703_s27  ;;  %s1436_s6 = int_to_ptr.vmem [resolvable:$true] %s163_s6 }
  0x4e   : > { %p1632_p2 = scmp.lt.s32.totalorder %s1192_s22, 6  ;;  %s1444_s7 = scalar_lea.sflag [#allocation6], %s152_s5 }
  0x4f   : > { %s1012_s8 = scalar_lea.hbm %s1434_s24, 1024  ;;  %s1017_s3 = scalar_lea.hbm %s1598_s1, 3072 }
  0x50   : > { %p1440_p1 = pnand %p1632_p2, %p75_p9  ;;  %p1013_p6 = scmp.ne.s32.totalorder %s1434_s24, %s1012_s8 }
  0x51   : > { %p1018_p5 = scmp.lt.u32.totalorder %s1434_s24, %s1598_s1  ;;  %p1019_p4 = scmp.lt.u32.totalorder %s1017_s3, %s1012_s8 }
  0x52   : > { %p1014_p0 = pneg %p1440_p1  ;;  %p1021_p9 = scmp.lt.u32.totalorder %s1012_s8, %s1434_s24 }
  0x53   : > { %p1020_p7 = por %p1019_p4, %p1018_p5 }
  0x54   : > { %p1015_p13 = pnand %p1014_p0, %p1013_p6 }
  0x55   : > { %p1022_p2 = por %p1021_p9, %p1020_p7 }
  0x56   : > { %p1016_p3 = pneg %p1015_p13 }
  0x58   : > { %p1023_p12 = pnand %p1022_p2, %p1016_p3 }
  0x5a   : > { %1026 = shalt.err (!%p1023_p12)
}
  0x5b   : > { %s1027_s5 = scalar_lea.vmem %s1436_s6, 1024  ;;  %s1197_s26 = smov [#allocation5]  }
  0x5c   : > { %p1028_p6 = scmp.ne.s32.totalorder %s1436_s6, %s1027_s5  ;;  %s1032_s27 = sshll.u32 %s1197_s26, 4  ;;  %s1033_s27 = int_to_ptr.vmem [resolvable:$false] %s1032_s27 }
  0x5d   : > { %s1034_s21 = scalar_lea.vmem %s1033_s27, 2048  ;;  %p1035_p11 = scmp.lt.s32.totalorder %s1436_s6, %s1033_s27 }
  0x5e   : > { %p1030_p13 = pnand %p1028_p6, %p1014_p0  ;;  %p1036_p5 = scmp.lt.s32.totalorder %s1034_s21, %s1027_s5 }
  0x60   : > { %p1031_p8 = pneg %p1030_p13  ;;  %p1037_p4 = por %p1036_p5, %p1035_p11 }
  0x62   : > { %p1038_p7 = pnand %p1037_p4, %p1031_p8 }
  0x64   : > { %1041 = shalt.err (!%p1038_p7)
}
  0x65   : > { %s1634_s8 = smov 4   ;;  %s1635_s3 = smov 64  }
  0x66   : > { %843 = dma.hbm_to_vmem [thread:$0]  (!%p1440_p1), %s1434_s24, 1024, %s1436_s6, %s1444_s7, %s1635_s3, %s1635_s3, %s1634_s8  }
  0x67   : > { %175 = sbr.rel (%p1378_p10) target bundleno = 388 (0x184), region = 28  ;;  %s177_s12 = sand.u32 (!%p1378_p10), 1, %s1168_s16  }
  0x68   : > { %s661_s26 = sshll.u32 (!%p1378_p10), %s177_s12, 6  ;;  %s178_s5 = scalar_lea.sflag (!%p1378_p10), [#allocation3], %s177_s12 }
  0x69   : > { %s1478_s27 = scalar_lea.vmem (!%p1378_p10), [#allocation2], %s661_s26  ;;  %p1636_p11 = scmp.ne.s32.totalorder (!%p1378_p10), %s1619_s29, 0 }
  0x6e   : > { %1127 = dma.done.wait (%p1636_p11), %s178_s5, 1024  }
  0x6f   : > { %1129 = vsyncadd (%p1636_p11), %s178_s5, 4294966272  ;;  %s186_s23 = sand.u32 1, %s1156_s13   ;;  %p1637_p10 = scmp.ne.s32.totalorder %s1628_s25, 0 }
  0x70   : > { %s662_s21 = sshll.u32 %s186_s23, 6  ;;  %s187_s6 = scalar_lea.sflag [#allocation6], %s186_s23 }
  0x71   : > { %s1485_s24 = scalar_lea.vmem [#allocation5], %s662_s21 }
  0x72   : > { %1131 = dma.done.wait (%p1637_p10), %s187_s6, 1024  }
  0x73   : > { %1133 = vsyncadd (%p1637_p10), %s187_s6, 4294966272  ;;  %v966_v0 = vld [vmem:[%s1485_s24] sm:$0xff]   ;;  %v967_v1 = vld [vmem:[%s1485_s24 + $0x8] sm:$0xff]   ;;  %s213_s29 = sand.u32 1, %s1144_s10   ;;  %s697_s25 = sshll.u32 %s1176_s18, 4 }
  0x74   : > { %783 = vmatprep.subr.bf16.mxu0 %v966_v0  ;;  %815 = vmatprep.subr.bf16.mxu1 %v966_v0  ;;  %v968_v2 = vld [vmem:[%s1485_s24 + $0x10] sm:$0xff]   ;;  %v969_v3 = vld [vmem:[%s1485_s24 + $0x18] sm:$0xff]   ;;  %v974_v4 = vld [vmem:[%s1478_s27] sm:$0xff]   ;;  %s663_s4 = sshll.u32 %s213_s29, 6  ;;  %s698_s7 = sshll.u32 %s1180_s19, 5 }
  0x75   : > { %784 = vmatpush3.bf16.msra.mxu0 %v966_v0  ;;  %823 = vmatpush3.bf16.msra.mxu1 %v966_v0  ;;  %v975_v5 = vld [vmem:[%s1478_s27 + $0x20] sm:$0xff]   ;;  %v971_v7 = vld [vmem:[%s1485_s24 + $0x28] sm:$0xff]   ;;  %v972_v8 = vld [vmem:[%s1485_s24 + $0x30] sm:$0xff]   ;;  %s215_s8 = scalar_lea.vmem [#allocation7], %s663_s4  ;;  %s537_s3 = sadd.s32 %s698_s7, %s697_s25 }
  0x76   : > { %785 = vmatprep.subr.bf16.mxu0 %v967_v1  ;;  %816 = vmatprep.subr.bf16.mxu1 %v967_v1  ;;  %v970_v6 = vld [vmem:[%s1485_s24 + $0x20] sm:$0xff]   ;;  %v973_v9 = vld [vmem:[%s1485_s24 + $0x38] sm:$0xff]   ;;  %v976_v10 = vld [vmem:[%s1478_s27 + $0x8] sm:$0xff]   ;;  %s540_s12 = sshll.u32 %s215_s8, 4  ;;  %s699_s26 = sshll.u32 %s537_s3, 6  ;;  %s1512_s12 = int_to_ptr.vmem [resolvable:$true] %s540_s12 }
  0x77   : > { %799 = vmatprep.mubr.bf16.mxu0 %v974_v4  ;;  %807 = vmatprep.mubr.bf16.mxu1 %v975_v5  ;;  %v977_v11 = vld [vmem:[%s1478_s27 + $0x28] sm:$0xff]   ;;  %v978_v12 = vld [vmem:[%s1478_s27 + $0x10] sm:$0xff]   ;;  %v980_v14 = vld [vmem:[%s1478_s27 + $0x18] sm:$0xff]   ;;  %s1517_s5 = scalar_lea.hbm %s1599_s2, %s699_s26  ;;  %s1042_s23 = scalar_lea.vmem %s1512_s12, 1024 }
  0x78   : > { %v979_v13 = vld [vmem:[%s1478_s27 + $0x30] sm:$0xff]   ;;  %v981_v15 = vld [vmem:[%s1478_s27 + $0x38] sm:$0xff]   ;;  %s1521_s27 = scalar_lea.sflag [#allocation4], %s213_s29  ;;  %p1043_p8 = scmp.ne.s32.totalorder %s1512_s12, %s1042_s23 }
  0x79   : > { %786 = vmatpush3.bf16.msra.mxu0 %v967_v1  ;;  %824 = vmatpush3.bf16.msra.mxu1 %v967_v1  ;;  %p1638_p12 = scmp.ne.s32.totalorder %s1629_s20, 0  ;;  %s1198_s21 = smov [#allocation7]  }
  0x7a   : > { %787 = vmatprep.subr.bf16.mxu0 %v968_v2  ;;  %817 = vmatprep.subr.bf16.mxu1 %v968_v2  ;;  %s1046_s6 = sshll.u32 %s1198_s21, 4  ;;  %s1047_s6 = int_to_ptr.vmem [resolvable:$false] %s1046_s6 }
  0x7b   : > { %p1044_p1 = pnand %p1043_p8, %p1638_p12  ;;  %s1048_s24 = scalar_lea.vmem %s1047_s6, 2048 }
  0x7c   : > { %p1049_p3 = scmp.lt.s32.totalorder %s1512_s12, %s1047_s6  ;;  %p1050_p9 = scmp.lt.s32.totalorder %s1048_s24, %s1042_s23 }
  0x7d   : > { %788 = vmatpush3.bf16.msra.mxu0 %v968_v2  ;;  %825 = vmatpush3.bf16.msra.mxu1 %v968_v2  ;;  %p1045_p0 = pneg %p1044_p1 }
  0x7e   : > { %789 = vmatprep.subr.bf16.mxu0 %v969_v3  ;;  %818 = vmatprep.subr.bf16.mxu1 %v969_v3  ;;  %p1051_p2 = por %p1050_p9, %p1049_p3 }
  0x80   : > { %p1052_p6 = pnand %p1051_p2, %p1045_p0 }
  0x81   : > { %790 = vmatpush3.bf16.msra.mxu0 %v969_v3  ;;  %826 = vmatpush3.bf16.msra.mxu1 %v969_v3 }
  0x82   : > { %791 = vmatprep.subr.bf16.mxu0 %v970_v6  ;;  %819 = vmatprep.subr.bf16.mxu1 %v970_v6 }
  0x85   : > { %792 = vmatpush3.bf16.msra.mxu0 %v970_v6  ;;  %827 = vmatpush3.bf16.msra.mxu1 %v970_v6 }
  0x86   : > { %793 = vmatprep.subr.bf16.mxu0 %v971_v7  ;;  %820 = vmatprep.subr.bf16.mxu1 %v971_v7 }
  0x89   : > { %794 = vmatpush3.bf16.msra.mxu0 %v971_v7  ;;  %828 = vmatpush3.bf16.msra.mxu1 %v971_v7 }
  0x8a   : > { %795 = vmatprep.subr.bf16.mxu0 %v972_v8  ;;  %821 = vmatprep.subr.bf16.mxu1 %v972_v8 }
  0x8d   : > { %796 = vmatpush3.bf16.msra.mxu0 %v972_v8  ;;  %829 = vmatpush3.bf16.msra.mxu1 %v972_v8 }
  0x8e   : > { %797 = vmatprep.subr.bf16.mxu0 %v973_v9  ;;  %822 = vmatprep.subr.bf16.mxu1 %v973_v9 }
  0x91   : > { %798 = vmatpush3.bf16.msra.mxu0 %v973_v9  ;;  %830 = vmatpush3.bf16.msra.mxu1 %v973_v9 }
  0x94   : > { %800 = vmatmul.mubr.bf16.vlgmr.msra.gmra.mrb[0].mxu0 %v976_v10  ;;  %808 = vmatmul.mubr.bf16.vlgmr.msra.gmra.mrb[0].mxu1 %v977_v11 }
  0x95   : > { %803 = vmatprep.mubr.bf16.mxu0 %v978_v12  ;;  %811 = vmatprep.mubr.bf16.mxu1 %v979_v13 }
  0x9c   : > { %804 = vmatmul.mubr.bf16.gmra.mrb[4].mxu0 %v980_v14  ;;  %812 = vmatmul.mubr.bf16.gmra.mrb[4].mxu1 %v981_v15 }
 0x167   : > { %v801_v16 = vpop.f32.mrb[0].mxu0  ;;  %v809_v17 = vpop.f32.mrb[0].mxu1 }
 0x168   : > { %v381_v18 = vpop.f32.mrb[1].mxu0  ;;  %v413_v19 = vpop.f32.mrb[1].mxu1 }
 0x169   : > { %v802_v20 = vpop.f32.mrb[2].mxu0  ;;  %v810_v21 = vpop.f32.mrb[2].mxu1 }
 0x16a   : > { %v728_v22 = vpack.c.bf16 %v802_v20, %v801_v16  ;;  %v748_v23 = vpack.c.bf16 %v810_v21, %v809_v17  ;;  %v384_v24 = vpop.f32.mrb[3].mxu0  ;;  %v416_v25 = vpop.f32.mrb[3].mxu1 }
 0x16b   : > { %v723_v26 = vpack.c.bf16 %v384_v24, %v381_v18  ;;  %v743_v27 = vpack.c.bf16 %v416_v25, %v413_v19 }
 0x16c   : > { %760 = vst [vmem:[%s215_s8 + $0x8] sm:$0xff] %v728_v22   ;;  %764 = vst [vmem:[%s215_s8 + $0x28] sm:$0xff] %v748_v23  }
 0x16d   : > { %724 = vst [vmem:[%s215_s8] sm:$0xff] %v723_v26   ;;  %763 = vst [vmem:[%s215_s8 + $0x20] sm:$0xff] %v743_v27  }
 0x16f   : > { %v805_v28 = vpop.f32.mrb[4].mxu0  ;;  %v813_v29 = vpop.f32.mrb[4].mxu1 }
 0x170   : > { %v397_v30 = vpop.f32.mrb[5].mxu0  ;;  %v429_v31 = vpop.f32.mrb[5].mxu1 }
 0x171   : > { %v806_v32 = vpop.f32.mrb[6].mxu0  ;;  %v814_v33 = vpop.f32.mrb[6].mxu1 }
 0x172   : > { %v738_v34 = vpack.c.bf16 %v806_v32, %v805_v28  ;;  %v758_v35 = vpack.c.bf16 %v814_v33, %v813_v29  ;;  %v400_v36 = vpop.f32.mrb[7].mxu0  ;;  %v432_v37 = vpop.f32.mrb[7].mxu1 }
 0x173   : > { %v733_v38 = vpack.c.bf16 %v400_v36, %v397_v30  ;;  %v753_v39 = vpack.c.bf16 %v432_v37, %v429_v31 }
 0x174   : > { %762 = vst [vmem:[%s215_s8 + $0x18] sm:$0xff] %v738_v34   ;;  %766 = vst [vmem:[%s215_s8 + $0x38] sm:$0xff] %v758_v35  }
 0x175   : > { %761 = vst [vmem:[%s215_s8 + $0x10] sm:$0xff] %v733_v38   ;;  %765 = vst [vmem:[%s215_s8 + $0x30] sm:$0xff] %v753_v39  }
 0x176   : > { %1055 = shalt.err (!%p1052_p6)
}
 0x177   : > { %s1056_s29 = scalar_lea.hbm %s1517_s5, 1024  ;;  %s1060_s7 = scalar_lea.hbm %s1599_s2, 6144 }
 0x178   : > { %p1057_p13 = scmp.ne.s32.totalorder %s1517_s5, %s1056_s29  ;;  %p1061_p7 = scmp.lt.u32.totalorder %s1517_s5, %s1599_s2 }
 0x179   : > { %p1062_p11 = scmp.lt.u32.totalorder %s1060_s7, %s1056_s29  ;;  %p1064_p8 = scmp.lt.u32.totalorder %s1056_s29, %s1517_s5 }
 0x17a   : > { %p1058_p5 = pnand %p1057_p13, %p1638_p12 }
 0x17b   : > { %p1063_p10 = por %p1062_p11, %p1061_p7 }
 0x17c   : > { %p1059_p4 = pneg %p1058_p5 }
 0x17d   : > { %p1065_p1 = por %p1064_p8, %p1063_p10 }
 0x17f   : > { %p1066_p0 = pnand %p1065_p1, %p1059_p4 }
 0x181   : > { %1069 = shalt.err (!%p1066_p0)
}
 0x182   : > { %s1199_s26 = smov 64   ;;  %s1200_s18 = smov 4  }
 0x183   : > { %835 = dma.vmem_to_hbm [thread:$0]  (%p1638_p12), %s1512_s12, 1024, %s1517_s5, %s1521_s27, %s1199_s26, %s1199_s26, %s1200_s18  }
 0x184 PF: > { %p849_p3 = scmp.ge.s32.totalorder %s1192_s22, 2  ;;  %s555_s19 = sand.u32 1, %s1140_s9  }
 0x185   : > { %p1639_p9 = scmp.ne.s32.totalorder %s1631_s0, 0  ;;  %s556_s23 = scalar_lea.sflag [#allocation4], %s555_s19 }
 0x187   : > { %p845_p2 = pnand %p849_p3, %p1639_p9 }
 0x189   : > { %1135 = dma.done.wait (!%p845_p2), %s556_s23, 1024  }
 0x18a   : > { %1137 = vsyncadd (!%p845_p2), %s556_s23, 4294966272  ;;  %s21_s22 = sadd.s32 1, %s1192_s22   ;;  %s1641_s18 = sld [smem:[#allocation11_spill]] }
 0x18b   : > { %p1550_p6 = scmp.ge.s32.totalorder %s21_s22, 8   ;;  %s1642_s19 = sld [smem:[#allocation12_spill]] }
 0x18c   : > { %s1643_s20 = sld [smem:[#allocation13_spill]]  ;;  %s1644_s0 = sld [smem:[#allocation14_spill]] }
 0x18d   : > { %s1646_s9 = smov %s1144_s10  ;;  %s1647_s10 = smov %s1148_s11 }
 0x18e   : > { %s1648_s11 = smov %s1418_s28  ;;  %s1649_s12 = smov %s1156_s13 }
 0x18f   : > { %s1650_s13 = smov %s1160_s14  ;;  %s1651_s14 = smov %s1415_s15 }
 0x190   : > { %s1652_s15 = smov %s1168_s16  ;;  %s1653_s16 = smov %s1172_s17 }
 0x191   : > { %s1654_s17 = smov %s1319_s30  ;;  %20 = sbr.rel (!%p1550_p6) target bundleno = 14 (0xe), region = 86 }
 0x192   : > { %s1655_s21 = smov %s1644_s0 }
 0x198   :  { %561 = vsyncpa [#allocation3], 1 }
 0x199   :  { %563 = vsyncpa [#allocation3 + $0x1], 1 }
 0x19a   :  { %564 = vsyncpa [#allocation6], 1 }
 0x19b   :  { %566 = vsyncpa [#allocation6 + $0x1], 1 }
 0x19c   :  { %567 = vsyncpa [#allocation4], 1 }
 0x19d   :  { %569 = vsyncpa [#allocation4 + $0x1], 1 }

</bundles_post_ra>
